<compile_context>
chip_gen: v7x
topology: tpu7x:2x2x1
jax: 0.10.0
libtpu: 0.0.40
codegen_flags: <defaults>
</compile_context>

<pallas_src>
import math

import jax
import jax.numpy as jnp
from jax.experimental import pallas as pl
from jax.experimental.pallas import tpu as pltpu

_VMEM_TILE_BUDGET = 24 * 1024 * 1024   # bytes for double-buffered in+out tiles
_VMEM_LIMIT_BYTES = 48 * 1024 * 1024   # raised scoped VMEM limit (fits v7x)


def channel_selection_kernel(x_ref, idx_ref, o_ref):
    # x_ref:   (TILE_R, L) tile of the row-flattened, lane-packed input
    # idx_ref: (1, L) per-channel scales (already in the output dtype),
    #          resident in VMEM across the whole grid
    # o_ref:   (TILE_R, L) output tile (promoted dtype)
    o_ref[...] = x_ref[...].astype(o_ref.dtype) * idx_ref[...]


def _lane_pack(x2d, scale, c):
    """Fold k rows into one so the last dim is a multiple of 128 (lane-dense).

    Only applied when the fold divides the row count evenly; otherwise the
    un-packed (possibly masked-store) path is kept — padding in HBM would
    cost an extra full-tensor copy and lose more than masked stores do."""
    rows = x2d.shape[0]
    if c % 128 == 0:
        return x2d, scale
    k = 128 // math.gcd(c, 128)          # k * c == lcm(c, 128)
    if k > 1 and rows % k == 0:
        x2d = x2d.reshape(rows // k, k * c)
        scale = jnp.tile(scale, k)
    return x2d, scale


def _sublane_align(dtype):
    """Minimum sublane multiple for dense vreg packing of this dtype."""
    itemsize = jnp.dtype(dtype).itemsize
    return max(8, 32 // max(1, itemsize))   # f32->8, bf16->16, int8/fp8->32


def _choose_tile_rows(total_rows, lane_width, in_dtype, out_dtype):
    """Largest aligned row tile whose double-buffered in+out copies fit budget."""
    in_b = jnp.dtype(in_dtype).itemsize
    out_b = jnp.dtype(out_dtype).itemsize
    align = max(_sublane_align(in_dtype), _sublane_align(out_dtype))
    bytes_per_row = 2 * lane_width * (in_b + out_b)   # 2x for double buffering
    max_rows = max(align, _VMEM_TILE_BUDGET // bytes_per_row)
    if max_rows >= total_rows:
        return total_rows                              # single / full-extent tile
    tile = max(align, (max_rows // align) * align)     # keep (8,128)-compatible
    # Prefer a tile that divides the row count evenly (no ragged last tile).
    for cand in range(tile, align - 1, -align):
        if total_rows % cand == 0:
            return cand
    return tile


def channel_selection(x, indexes):
    """Pallas equivalent of ChannelSelection.forward: x * indexes,
    broadcasting `indexes` against the last dim of x (PyTorch semantics)."""
    orig_shape = x.shape
    c = orig_shape[-1]
    assert indexes.shape == (c,), "indexes must have shape [num_channels]"

    out_dtype = jnp.promote_types(x.dtype, indexes.dtype)

    rows = math.prod(orig_shape[:-1]) if len(orig_shape) > 1 else 1
    x2d = x.reshape(rows, c)

    # Lane-dense packing (no data movement; just a contiguous reshape).
    x2d, scale = _lane_pack(x2d, indexes, c)
    r2, lane_w = x2d.shape
    # Pre-cast the (tiny) scale once so the kernel does not re-cast per step.
    scale2d = scale.astype(out_dtype).reshape(1, lane_w)

    tile_rows = _choose_tile_rows(r2, lane_w, x.dtype, out_dtype)
    grid = (pl.cdiv(r2, tile_rows),)

    in_b = jnp.dtype(x.dtype).itemsize
    out_b = jnp.dtype(out_dtype).itemsize
    total = rows * c
    cost = pl.CostEstimate(
        flops=total,
        transcendentals=0,
        bytes_accessed=total * (in_b + out_b)
        + c * jnp.dtype(indexes.dtype).itemsize,
    )

    out2d = pl.pallas_call(
        channel_selection_kernel,
        out_shape=jax.ShapeDtypeStruct((r2, lane_w), out_dtype),
        grid_spec=pltpu.PrefetchScalarGridSpec(
            num_scalar_prefetch=0,
            grid=grid,
            in_specs=[
                pl.BlockSpec((tile_rows, lane_w), lambda r: (r, 0)),
                pl.BlockSpec((1, lane_w), lambda r: (0, 0)),
            ],
            out_specs=pl.BlockSpec((tile_rows, lane_w), lambda r: (r, 0)),
        ),
        compiler_params=pltpu.CompilerParams(
            dimension_semantics=("parallel",),
            vmem_limit_bytes=_VMEM_LIMIT_BYTES,
        ),
        cost_estimate=cost,
    )(x2d, scale2d)

    return out2d.reshape(orig_shape)


if __name__ == "__main__":
    # Small shapes consistent with a ViT token tensor: [batch, seq, hidden]
    B, S, C = 2, 8, 32

    key = jax.random.PRNGKey(0)
    kx, ks = jax.random.split(key)
    x = jax.random.normal(kx, (B, S, C), dtype=jnp.float32)

    # Parameter init mirrors nn.Parameter(torch.ones(num_channels))
    indexes = jnp.ones((C,), dtype=jnp.float32)

    out = jax.block_until_ready(channel_selection(x, indexes))
    ref = x * indexes.reshape(1, 1, C)
    assert out.shape == x.shape
    assert out.dtype == jnp.promote_types(x.dtype, indexes.dtype)
    assert jnp.allclose(out, ref, atol=1e-6), "mismatch vs reference (ones)"

    # Non-trivial scale so the multiply is actually exercised.
    scale = jax.random.normal(ks, (C,), dtype=jnp.float32)
    out2 = jax.block_until_ready(channel_selection(x, scale))
    ref2 = x * scale.reshape(1, 1, C)
    assert jnp.allclose(out2, ref2, atol=1e-6), "mismatch vs reference (random)"

    # Mixed-dtype check (bf16 activations x f32 parameter -> f32, like PyTorch).
    xb = x.astype(jnp.bfloat16)
    out3 = jax.block_until_ready(channel_selection(xb, scale))
    ref3 = xb.astype(jnp.float32) * scale.reshape(1, 1, C)
    assert out3.dtype == jnp.float32
    assert jnp.allclose(out3, ref3, atol=1e-2), "mismatch vs reference (bf16)"

    print("KERNEL_OK")
</pallas_src>

<mosaic_0001>
module attributes {stable_mosaic.version = 11 : i64} {
  func.func @channel_selection_kernel(%arg0: i32, %arg1: memref<4x128xf32, #tpu.memory_space<vmem>>, %arg2: memref<1x128xf32, #tpu.memory_space<vmem>>, %arg3: memref<4x128xf32, #tpu.memory_space<vmem>>) attributes {dimension_semantics = [#tpu.dimension_semantics<parallel>], iteration_bounds = array<i64: 1>, scalar_prefetch = 0 : i64, scratch_operands = 0 : i64, tpu.core_type = #tpu.core_type<tc>, window_params = [{transform_indices = @transform_0, window_bounds = array<i64: 4, 128>}, {pipeline_mode = #tpu.pipeline_mode<synchronous>, transform_indices = @transform_1, window_bounds = array<i64: 1, 128>}, {transform_indices = @transform_2, window_bounds = array<i64: 4, 128>}]} {
    %c0 = arith.constant 0 : index
    %c0_0 = arith.constant 0 : index
    %0 = vector.load %arg1[%c0, %c0_0] : memref<4x128xf32, #tpu.memory_space<vmem>>, vector<4x128xf32>
    %c0_1 = arith.constant 0 : index
    %c0_2 = arith.constant 0 : index
    %1 = vector.load %arg2[%c0_1, %c0_2] : memref<1x128xf32, #tpu.memory_space<vmem>>, vector<1x128xf32>
    %2 = vector.broadcast %1 : vector<1x128xf32> to vector<4x128xf32>
    %3 = arith.mulf %0, %2 : vector<4x128xf32>
    %c0_3 = arith.constant 0 : index
    %c0_4 = arith.constant 0 : index
    %4 = vector.load %arg3[%c0_3, %c0_4] : memref<4x128xf32, #tpu.memory_space<vmem>>, vector<4x128xf32>
    tpu.vector_store %arg3[%c0_3, %c0_4], %3 {strides = array<i32>} : memref<4x128xf32, #tpu.memory_space<vmem>>, vector<4x128xf32>,
    return
  }
  func.func @transform_0(%arg0: i32) -> (i32, i32) {
    %c0_i32 = arith.constant 0 : i32
    %c0_i32_0 = arith.constant 0 : i32
    return %arg0, %c0_i32 : i32, i32
  }
  func.func @transform_1(%arg0: i32) -> (i32, i32) {
    %c0_i32 = arith.constant 0 : i32
    %c0_i32_0 = arith.constant 0 : i32
    %c0_i32_1 = arith.constant 0 : i32
    return %c0_i32, %c0_i32_0 : i32, i32
  }
  func.func @transform_2(%arg0: i32) -> (i32, i32) {
    %c0_i32 = arith.constant 0 : i32
    %c0_i32_0 = arith.constant 0 : i32
    return %arg0, %c0_i32 : i32, i32
  }
}

</mosaic_0001>

<bundles_post_ra>
// kernel: tpu_custom_call.1
= control target key start
LH: loop header
LB: loop body
LE: loop exit
PB: predicated region body
PF: predicated region fallthrough
CT: control target
= control target key end

     0   :  { %7 = vsyncpa [#allocation3], 0  ;;  %s144_s0 = inlined_call_operand.hbm [shape: f32[4,128], index: 0, kind: input, shape index: {}]   ;;  %s145_s1 = inlined_call_operand.vmem [shape: f32[1,128], index: 1, kind: input, shape index: {}]   ;;  %s146_s2 = inlined_call_operand.hbm [shape: f32[4,128], index: 2, kind: output, shape index: {}]  }
   0x1   :  { %8 = vsyncpa [#allocation4], 0  ;;  %s100_s9 = smov [#allocation2]   ;;  %s52_s13 = scalar_lea.hbm %s144_s0, 64 }
   0x2   :  { %s15_s10 = sshll.u32 %s100_s9, 4  ;;  %p53_p0 = scmp.ne.s32.totalorder %s144_s0, %s52_s13  ;;  %s16_s10 = int_to_ptr.vmem [resolvable:$true] %s15_s10 }
   0x3   :  { %p56_p1 = scmp.lt.u32.totalorder %s52_s13, %s144_s0 }
   0x5   :  { %p58_p2 = pnand %p56_p1, %p53_p0 }
   0x7   :  { %61 = shalt.err (!%p58_p2)
}
   0x8   :  { %s62_s18 = scalar_lea.vmem %s16_s10, 64  ;;  %p67_p4 = scmp.lt.s32.totalorder %s16_s10, %s16_s10 }
   0x9   :  { %p63_p3 = scmp.ne.s32.totalorder %s16_s10, %s62_s18  ;;  %p68_p5 = scmp.lt.s32.totalorder %s62_s18, %s62_s18 }
   0xb   :  { %p69_p6 = por %p68_p5, %p67_p4 }
   0xd   :  { %p70_p7 = pnand %p69_p6, %p63_p3 }
   0xf   :  { %73 = shalt.err (!%p70_p7)
}
  0x10   :  { %18 = dma.hbm_to_vmem [thread:$0]  %s144_s0, 64, %s16_s10, [#allocation3]  }
  0x11   :  { %96 = dma.done.wait [#allocation3], 64  }
  0x12   :  { %97 = vsyncadd [#allocation3], 4294967232  ;;  %s101_s21 = smov [#allocation5]   ;;  %v24_v0 = vld [vmem:[#allocation2] sm:$0xf] }
  0x13   :  { %s40_s22 = sshll.u32 %s101_s21, 4  ;;  %v49_v1 = vld [vmem:[%s145_s1] ss:$0 sm:$0xff]  ;;  %s41_s22 = int_to_ptr.vmem [resolvable:$true] %s40_s22 }
  0x14   :  { %v32_v2 = vmul.f32 %v49_v1, %v24_v0  ;;  %s74_s25 = scalar_lea.vmem %s41_s22, 64  ;;  %p79_p9 = scmp.lt.s32.totalorder %s41_s22, %s41_s22 }
  0x15   :  { %p75_p8 = scmp.ne.s32.totalorder %s41_s22, %s74_s25  ;;  %p80_p10 = scmp.lt.s32.totalorder %s74_s25, %s74_s25 }
  0x16   :  { %33 = vst [vmem:[#allocation5] sm:$0xf] %v32_v2 }
  0x17   :  { %p81_p11 = por %p80_p10, %p79_p9 }
  0x19   :  { %p82_p12 = pnand %p81_p11, %p75_p8 }
  0x1b   :  { %85 = shalt.err (!%p82_p12)
}
  0x1c   :  { %s86_s27 = scalar_lea.hbm %s146_s2, 64 }
  0x1d   :  { %p87_p13 = scmp.ne.s32.totalorder %s146_s2, %s86_s27  ;;  %p90_p0 = scmp.lt.u32.totalorder %s86_s27, %s146_s2 }
  0x1f   :  { %p92_p1 = pnand %p90_p0, %p87_p13 }
  0x21   :  { %95 = shalt.err (!%p92_p1)
}
  0x22   :  { %43 = dma.vmem_to_hbm [thread:$0]  %s41_s22, 64, %s146_s2, [#allocation4]  }
  0x23   :  { %98 = dma.done.wait [#allocation4], 64  }
  0x24   :  { %99 = vsyncadd [#allocation4], 4294967232 }
  0x25   :  { %47 = vsyncpa [#allocation3], 1 }
  0x26   :  { %48 = vsyncpa [#allocation4], 1 }

</bundles_post_ra>
